<compile_context>
chip_gen: v5e
topology: v5e:2x2
jax: 0.10.0
libtpu: 0.0.40
codegen_flags: <defaults>
</compile_context>

<pallas_src>
import functools

import jax
import jax.numpy as jnp
from jax.experimental import pallas as pl
from jax.experimental.pallas import tpu as pltpu

MOLE_ORDER = 5   # => mole_coefficients has MOLE_ORDER + 1 entries
DENO_ORDER = 4   # => deno_coefficients has DENO_ORDER entries

LANES = 1024          # lane-dense slab width (multiple of 128)
MAX_BLOCK_ROWS = 512  # (512, 1024) f32 tile = 2 MiB per buffer


def _rational_kernel(mole_ref, deno_ref, x_ref, o_ref, *, mole_order, deno_order):
    """Elementwise rational basis: Horner numerator / (|Horner denom * x| + 1).

    mole_ref / deno_ref are SMEM coefficient tables; x_ref / o_ref are
    (block_rows, LANES) VMEM tiles.
    """
    x = x_ref[...].astype(jnp.float32)

    # Hoist all SMEM scalar reads once, before the unrolled Horner chains.
    mole_c = [mole_ref[i] for i in range(mole_order + 1)]
    deno_c = [deno_ref[i] for i in range(deno_order)]

    # Numerator: Horner evaluation, highest coefficient first.
    mole = jnp.full(x.shape, mole_c[mole_order], dtype=jnp.float32)
    for i in range(mole_order - 1, -1, -1):
        mole = mole * x + mole_c[i]

    # Denominator polynomial, then |Q(x) * x| + 1.
    deno = jnp.full(x.shape, deno_c[deno_order - 1], dtype=jnp.float32)
    for i in range(deno_order - 2, -1, -1):
        deno = deno * x + deno_c[i]
    deno = jnp.abs(deno * x) + 1.0

    # reciprocal + mul: offloads the divide to the EUP; approx=False keeps
    # 1e-5 parity with the exact PyTorch divide.
    o_ref[...] = (mole * pl.reciprocal(deno, approx=False)).astype(o_ref.dtype)


def rational_basis_function(x, mole_coefficients, deno_coefficients):
    """Apply the rational basis function elementwise to x (any shape)."""
    orig_shape = x.shape
    orig_dtype = x.dtype
    n = x.size

    flat = x.reshape(-1)
    rows = pl.cdiv(n, LANES)

    if rows <= MAX_BLOCK_ROWS:
        # Single block equal to the full (rows, LANES) array: no (8,128)
        # divisibility constraint applies, and (almost) no padding is needed.
        block_rows = rows
        padded_rows = rows
    else:
        block_rows = MAX_BLOCK_ROWS
        padded_rows = pl.cdiv(rows, block_rows) * block_rows

    padded = padded_rows * LANES
    needs_pad = padded != n
    if needs_pad:
        # TODO(synk): for very large ragged inputs, mask the tail in-kernel
        # instead of materializing a padded copy (extra HBM pass).
        flat = jnp.pad(flat, (0, padded - n))
    slab = flat.reshape(padded_rows, LANES)

    kernel = functools.partial(
        _rational_kernel, mole_order=MOLE_ORDER, deno_order=DENO_ORDER
    )

    out = pl.pallas_call(
        kernel,
        out_shape=jax.ShapeDtypeStruct((padded_rows, LANES), orig_dtype),
        grid_spec=pltpu.PrefetchScalarGridSpec(
            num_scalar_prefetch=0,
            grid=(padded_rows // block_rows,),
            in_specs=[
                pl.BlockSpec(memory_space=pltpu.MemorySpace.SMEM),  # mole coeffs
                pl.BlockSpec(memory_space=pltpu.MemorySpace.SMEM),  # deno coeffs
                pl.BlockSpec((block_rows, LANES), lambda i: (i, 0)),  # x tile
            ],
            out_specs=pl.BlockSpec((block_rows, LANES), lambda i: (i, 0)),
        ),
        compiler_params=pltpu.CompilerParams(
            dimension_semantics=("parallel",),  # megacore-shardable on v7x
        ),
    )(mole_coefficients, deno_coefficients, slab)

    if needs_pad:
        out = out.reshape(-1)[:n]
    return out.reshape(orig_shape)


def _reference(x, mole, deno):
    xf = x.astype(jnp.float32)
    m = jnp.full_like(xf, mole[MOLE_ORDER])
    for i in range(MOLE_ORDER - 1, -1, -1):
        m = m * xf + mole[i]
    d = jnp.full_like(xf, deno[DENO_ORDER - 1])
    for i in range(DENO_ORDER - 2, -1, -1):
        d = d * xf + deno[i]
    d = jnp.abs(d * xf) + 1.0
    return (m / d).astype(x.dtype)


if __name__ == "__main__":
    key = jax.random.PRNGKey(0)
    k_x, k_mole, k_deno = jax.random.split(key, 3)

    # Deterministic parameter init mirroring torch.randn(...) * 0.1 shapes.
    mole_coefficients = jax.random.normal(k_mole, (MOLE_ORDER + 1,), jnp.float32) * 0.1
    deno_coefficients = jax.random.normal(k_deno, (DENO_ORDER,), jnp.float32) * 0.1

    # Small NCHW-style input.
    x = jax.random.normal(k_x, (2, 4, 16, 16), jnp.float32)

    out = rational_basis_function(x, mole_coefficients, deno_coefficients)
    out = jax.block_until_ready(out)

    ref = _reference(x, mole_coefficients, deno_coefficients)
    assert out.shape == x.shape and out.dtype == x.dtype
    assert jnp.allclose(out, ref, atol=1e-5, rtol=1e-5)

    print("KERNEL_OK")
</pallas_src>

<mosaic_0001>
module attributes {stable_mosaic.version = 11 : i64} {
  func.func @_rational_kernel(%arg0: i32, %arg1: memref<6xf32, #tpu.memory_space<smem>>, %arg2: memref<4xf32, #tpu.memory_space<smem>>, %arg3: memref<2x1024xf32, #tpu.memory_space<vmem>>, %arg4: memref<2x1024xf32, #tpu.memory_space<vmem>>) attributes {dimension_semantics = [#tpu.dimension_semantics<parallel>], iteration_bounds = array<i64: 1>, scalar_prefetch = 0 : i64, scratch_operands = 0 : i64, tpu.core_type = #tpu.core_type<tc>, window_params = [{transform_indices = @transform_0, window_bounds = array<i64: 6>}, {transform_indices = @transform_1, window_bounds = array<i64: 4>}, {transform_indices = @transform_2, window_bounds = array<i64: 2, 1024>}, {transform_indices = @transform_3, window_bounds = array<i64: 2, 1024>}]} {
    %c0 = arith.constant 0 : index
    %c0_0 = arith.constant 0 : index
    %0 = vector.load %arg3[%c0, %c0_0] : memref<2x1024xf32, #tpu.memory_space<vmem>>, vector<2x1024xf32>
    %c0_1 = arith.constant 0 : index
    %1 = memref.load %arg1[%c0_1] : memref<6xf32, #tpu.memory_space<smem>>
    %c1 = arith.constant 1 : index
    %2 = memref.load %arg1[%c1] : memref<6xf32, #tpu.memory_space<smem>>
    %c2 = arith.constant 2 : index
    %3 = memref.load %arg1[%c2] : memref<6xf32, #tpu.memory_space<smem>>
    %c3 = arith.constant 3 : index
    %4 = memref.load %arg1[%c3] : memref<6xf32, #tpu.memory_space<smem>>
    %c4 = arith.constant 4 : index
    %5 = memref.load %arg1[%c4] : memref<6xf32, #tpu.memory_space<smem>>
    %c5 = arith.constant 5 : index
    %6 = memref.load %arg1[%c5] : memref<6xf32, #tpu.memory_space<smem>>
    %c0_2 = arith.constant 0 : index
    %7 = memref.load %arg2[%c0_2] : memref<4xf32, #tpu.memory_space<smem>>
    %c1_3 = arith.constant 1 : index
    %8 = memref.load %arg2[%c1_3] : memref<4xf32, #tpu.memory_space<smem>>
    %c2_4 = arith.constant 2 : index
    %9 = memref.load %arg2[%c2_4] : memref<4xf32, #tpu.memory_space<smem>>
    %c3_5 = arith.constant 3 : index
    %10 = memref.load %arg2[%c3_5] : memref<4xf32, #tpu.memory_space<smem>>
    %11 = vector.broadcast %6 : f32 to vector<2x1024xf32>
    %12 = arith.mulf %11, %0 : vector<2x1024xf32>
    %13 = vector.broadcast %5 : f32 to vector<2x1024xf32>
    %14 = arith.addf %12, %13 : vector<2x1024xf32>
    %15 = arith.mulf %14, %0 : vector<2x1024xf32>
    %16 = vector.broadcast %4 : f32 to vector<2x1024xf32>
    %17 = arith.addf %15, %16 : vector<2x1024xf32>
    %18 = arith.mulf %17, %0 : vector<2x1024xf32>
    %19 = vector.broadcast %3 : f32 to vector<2x1024xf32>
    %20 = arith.addf %18, %19 : vector<2x1024xf32>
    %21 = arith.mulf %20, %0 : vector<2x1024xf32>
    %22 = vector.broadcast %2 : f32 to vector<2x1024xf32>
    %23 = arith.addf %21, %22 : vector<2x1024xf32>
    %24 = arith.mulf %23, %0 : vector<2x1024xf32>
    %25 = vector.broadcast %1 : f32 to vector<2x1024xf32>
    %26 = arith.addf %24, %25 : vector<2x1024xf32>
    %27 = vector.broadcast %10 : f32 to vector<2x1024xf32>
    %28 = arith.mulf %27, %0 : vector<2x1024xf32>
    %29 = vector.broadcast %9 : f32 to vector<2x1024xf32>
    %30 = arith.addf %28, %29 : vector<2x1024xf32>
    %31 = arith.mulf %30, %0 : vector<2x1024xf32>
    %32 = vector.broadcast %8 : f32 to vector<2x1024xf32>
    %33 = arith.addf %31, %32 : vector<2x1024xf32>
    %34 = arith.mulf %33, %0 : vector<2x1024xf32>
    %35 = vector.broadcast %7 : f32 to vector<2x1024xf32>
    %36 = arith.addf %34, %35 : vector<2x1024xf32>
    %37 = arith.mulf %36, %0 : vector<2x1024xf32>
    %38 = math.absf %37 : vector<2x1024xf32>
    %cst = arith.constant 1.000000e+00 : f32
    %39 = vector.broadcast %cst : f32 to vector<2x1024xf32>
    %40 = arith.addf %38, %39 : vector<2x1024xf32>
    %41 = tpu.reciprocal %40 : vector<2x1024xf32> -> vector<2x1024xf32>
    %42 = arith.mulf %26, %41 : vector<2x1024xf32>
    %c0_6 = arith.constant 0 : index
    %c0_7 = arith.constant 0 : index
    %43 = vector.load %arg4[%c0_6, %c0_7] : memref<2x1024xf32, #tpu.memory_space<vmem>>, vector<2x1024xf32>
    tpu.vector_store %arg4[%c0_6, %c0_7], %42 {strides = array<i32>} : memref<2x1024xf32, #tpu.memory_space<vmem>>, vector<2x1024xf32>,
    return
  }
  func.func @transform_0(%arg0: i32) -> i32 {
    %c0_i32 = arith.constant 0 : i32
    %c0_i32_0 = arith.constant 0 : i32
    return %c0_i32 : i32
  }
  func.func @transform_1(%arg0: i32) -> i32 {
    %c0_i32 = arith.constant 0 : i32
    %c0_i32_0 = arith.constant 0 : i32
    return %c0_i32 : i32
  }
  func.func @transform_2(%arg0: i32) -> (i32, i32) {
    %c0_i32 = arith.constant 0 : i32
    %c0_i32_0 = arith.constant 0 : i32
    return %arg0, %c0_i32 : i32, i32
  }
  func.func @transform_3(%arg0: i32) -> (i32, i32) {
    %c0_i32 = arith.constant 0 : i32
    %c0_i32_0 = arith.constant 0 : i32
    return %arg0, %c0_i32 : i32, i32
  }
}

</mosaic_0001>

<bundles_post_ra>
// kernel: tpu_custom_call.1
= control target key start
LH: loop header
LB: loop body
LE: loop exit
PB: predicated region body
PF: predicated region fallthrough
CT: control target
= control target key end

     0   :  { %8 = vsyncpa [#allocation5], 0  ;;  %s306_s0 = inlined_call_operand.hbm [shape: f32[6], index: 0, kind: input, shape index: {}]   ;;  %s307_s1 = inlined_call_operand.hbm [shape: f32[4], index: 1, kind: input, shape index: {}]   ;;  %s308_s2 = inlined_call_operand.hbm [shape: f32[2,1024], index: 2, kind: input, shape index: {}]   ;;  %s309_s3 = inlined_call_operand.hbm [shape: f32[2,1024], index: 3, kind: output, shape index: {}]  }
   0x1   :  { %9 = vsyncpa [#allocation7], 0 }
   0x2   :  { %10 = vsyncpa [#allocation3], 0 }
   0x3   :  { %11 = vsyncpa [#allocation4], 0  ;;  %s17_s14 = sshll.u32 %s306_s0, 4  ;;  %s26_s17 = sshll.u32 %s307_s1, 4  ;;  %s18_s14 = int_to_ptr.hbm [resolvable:$true] %s17_s14  ;;  %s27_s17 = int_to_ptr.hbm [resolvable:$true] %s26_s17 }
   0x4   :  { %s261_s18 = smov [#allocation2]   ;;  %s262_s19 = smov [#allocation6]  }
   0x5   :  { %20 = dma.hbm_to_smem %s18_s14, 16, %s261_s18, [#allocation5]  }
   0x6   :  { %29 = dma.hbm_to_smem %s27_s17, 16, %s262_s19, [#allocation7]  }
   0x7   :  { %s35_s22 = sshll.u32 %s308_s2, 4  ;;  %s263_s23 = smov [#allocation8]   ;;  %s36_s22 = int_to_ptr.hbm [resolvable:$true] %s35_s22 }
   0x8   :  { %s37_s24 = sshll.u32 %s263_s23, 4  ;;  %s38_s24 = int_to_ptr.vmem [resolvable:$true] %s37_s24 }
   0x9   :  { %40 = dma.hbm_to_vmem [thread:$0]  %s36_s22, 256, %s38_s24, [#allocation3]  }
   0xa   :  { %253 = dma.done.wait [#allocation5], 16  }
   0xb   :  { %254 = vsyncadd [#allocation5], 4294967280 }
   0xc   :  { %255 = dma.done.wait [#allocation7], 16  }
   0xd   :  { %256 = vsyncadd [#allocation7], 4294967280 }
   0xe   :  { %257 = dma.done.wait [#allocation3], 256  }
   0xf   :  { %258 = vsyncadd [#allocation3], 4294967040 }
  0x10   :  { %53 = sfence }
  0x11   :  { %s168_s0 = sld [smem:[#allocation2 + $0x4]]  ;;  %v54_v0 = vld [vmem:[#allocation8] sm:$0xff]  ;;  %v55_v3 = vld [vmem:[#allocation8 + $0x8] sm:$0xff]  ;;  %s264_s5 = smov [#allocation9]  }
  0x12   :  { %s169_s1 = sld [smem:[#allocation2 + $0x5]]  ;;  %s151_s6 = sshll.u32 %s264_s5, 4  ;;  %s152_s6 = int_to_ptr.vmem [resolvable:$true] %s151_s6 }
  0x13   :  { %s171_s25 = sld [smem:[#allocation6 + $0x2]]  ;;  %s153_s9 = sshll.u32 %s309_s3, 4  ;;  %s154_s9 = int_to_ptr.hbm [resolvable:$true] %s153_s9 }
  0x14   :  { %s172_s26 = sld [smem:[#allocation6 + $0x3]] }
  0x15   :  { %s167_s27 = sld [smem:[#allocation2 + $0x3]] }
  0x16   :  { %s170_s28 = sld [smem:[#allocation6 + $0x1]] }
  0x17   :  { %v69_v2 = vstv %s168_s0  ;;  %s62_s2 = sld [smem:[#allocation6]] }
  0x18   :  { %v66_v1 = vstv %s169_s1  ;;  %s166_s29 = sld [smem:[#allocation2 + $0x2]] }
  0x19   :  { %v67_v4 = vmul.f32 %v66_v1, %v54_v0  ;;  %v68_v5 = vmul.f32 %v66_v1, %v55_v3  ;;  %v95_v9 = vstv %s171_s25  ;;  %s165_s30 = sld [smem:[#allocation2 + $0x1]] }
  0x1a   :  { %v92_v8 = vstv %s172_s26  ;;  %s294_s4 = sld [smem:[#allocation2]] }
  0x1b   :  { %v70_v6 = vadd.f32 %v69_v2, %v67_v4  ;;  %v71_v7 = vadd.f32 %v69_v2, %v68_v5  ;;  %v93_v10 = vmul.f32 %v92_v8, %v54_v0  ;;  %v94_v11 = vmul.f32 %v92_v8, %v55_v3 }
  0x1c   :  { %v74_v13 = vstv %s167_s27  ;;  %v100_v17 = vstv %s170_s28 }
  0x1d   :  { %v72_v12 = vmul.f32 %v70_v6, %v54_v0  ;;  %v96_v14 = vadd.f32 %v95_v9, %v93_v10  ;;  %v73_v15 = vmul.f32 %v71_v7, %v55_v3  ;;  %v97_v16 = vadd.f32 %v95_v9, %v94_v11 }
  0x1e   :  { %v105_v24 = vstv %s62_s2  ;;  %v79_v28 = vstv %s166_s29 }
  0x1f   :  { %v98_v18 = vmul.f32 %v96_v14, %v54_v0  ;;  %v99_v19 = vmul.f32 %v97_v16, %v55_v3  ;;  %v75_v20 = vadd.f32 %v74_v13, %v72_v12  ;;  %v76_v22 = vadd.f32 %v74_v13, %v73_v15 }
  0x20   :  { %v84_v41 = vstv %s165_s30  ;;  %v89_v48 = vstv %s294_s4 }
  0x21   :  { %v101_v21 = vadd.f32 %v100_v17, %v98_v18  ;;  %v102_v23 = vadd.f32 %v100_v17, %v99_v19  ;;  %v77_v27 = vmul.f32 %v75_v20, %v54_v0  ;;  %v78_v30 = vmul.f32 %v76_v22, %v55_v3 }
  0x23   :  { %v103_v25 = vmul.f32 %v101_v21, %v54_v0  ;;  %v104_v26 = vmul.f32 %v102_v23, %v55_v3  ;;  %v80_v34 = vadd.f32 %v79_v28, %v77_v27  ;;  %v81_v36 = vadd.f32 %v79_v28, %v78_v30 }
  0x25   :  { %v106_v29 = vadd.f32 %v105_v24, %v103_v25  ;;  %v107_v31 = vadd.f32 %v105_v24, %v104_v26  ;;  %v82_v40 = vmul.f32 %v80_v34, %v54_v0  ;;  %v83_v42 = vmul.f32 %v81_v36, %v55_v3 }
  0x27   :  { %v108_v32 = vmul.f32 %v106_v29, %v54_v0  ;;  %v109_v33 = vmul.f32 %v107_v31, %v55_v3  ;;  %v85_v43 = vadd.f32 %v84_v41, %v82_v40  ;;  %v86_v44 = vadd.f32 %v84_v41, %v83_v42 }
  0x29   :  { %v110_v35 = vand.u32 2147483647, %v108_v32  ;;  %v111_v37 = vand.u32 2147483647, %v109_v33  ;;  %v87_v47 = vmul.f32 %v85_v43, %v54_v0  ;;  %v88_v51 = vmul.f32 %v86_v44, %v55_v3 }
  0x2b   :  { %v112_v38 = vadd.f32 1.0, %v110_v35  ;;  %v113_v39 = vadd.f32 1.0, %v111_v37  ;;  %v90_v62 = vadd.f32 %v89_v48, %v87_v47  ;;  %v91_v1 = vadd.f32 %v89_v48, %v88_v51 }
  0x2d   :  { %177 = vrcp.f32 %v112_v38  ;;  %vm119_vm0 = vweird.f32 %v112_v38  ;;  %v125_v50 = vand.u32 2147483648, %v112_v38  ;;  %v123_v54 = vand.u32 2147483647, %v112_v38 }
  0x2e   :  { %179 = vrcp.f32 %v113_v39  ;;  %v139_v55 = vand.u32 2147483648, %v113_v39  ;;  %vm133_vm2 = vweird.f32 %v113_v39  ;;  %v137_v57 = vand.u32 2147483647, %v113_v39 }
  0x2f   :  { %v126_v60 = vor.u32 1.1754944e-38, %v125_v50  ;;  %vm124_vm5 = vcmp.eq.f32.partialorder %v123_v54, 8.507059e+37 }
  0x30   :  { %v140_v0 = vor.u32 1.1754944e-38, %v139_v55  ;;  %vm138_vm7 = vcmp.eq.f32.partialorder %v137_v57, 8.507059e+37 }
  0x33   :  { %v178_v45 = vpop.eup %177 }
  0x34   :  { %v180_v46 = vpop.eup %179  ;;  %v115_v49 = vmul.f32 %v178_v45, %v112_v38  ;;  %vm120_vm1 = vweird.f32 %v178_v45 }
  0x35   :  { %v129_v52 = vmul.f32 %v180_v46, %v113_v39  ;;  %vm134_vm3 = vweird.f32 %v180_v46  ;;  %vm297_vm4 = vmor %vm119_vm0, %vm120_vm1 }
  0x36   :  { %v116_v53 = vsub.f32 1.0, %v115_v49  ;;  %vm135_vm6 = vmor %vm133_vm2, %vm134_vm3 }
  0x37   :  { %v130_v56 = vsub.f32 1.0, %v129_v52 }
  0x38   :  { %v117_v58 = vmul.f32 %v178_v45, %v116_v53 }
  0x39   :  { %v131_v61 = vmul.f32 %v180_v46, %v130_v56 }
  0x3a   :  { %v118_v63 = vadd.f32 %v178_v45, %v117_v58 }
  0x3b   :  { %v132_v2 = vadd.f32 %v180_v46, %v131_v61 }
  0x3c   :  { %v122_v3 = vsel %vm297_vm4, %v178_v45, %v118_v63 }
  0x3d   :  { %v127_v4 = vsel %vm124_vm5, %v126_v60, %v122_v3  ;;  %v136_v5 = vsel %vm135_vm6, %v180_v46, %v132_v2 }
  0x3e   :  { %v142_v6 = vmul.f32 %v127_v4, %v90_v62  ;;  %v141_v7 = vsel %vm138_vm7, %v140_v0, %v136_v5 }
  0x3f   :  { %v143_v8 = vmul.f32 %v141_v7, %v91_v1 }
  0x40   :  { %144 = vst [vmem:[#allocation9] sm:$0xff] %v142_v6 }
  0x41   :  { %145 = vst [vmem:[#allocation9 + $0x8] sm:$0xff] %v143_v8 }
  0x42   :  { %156 = dma.vmem_to_hbm [thread:$0]  %s152_s6, 256, %s154_s9, [#allocation4]  }
  0x43   :  { %259 = dma.done.wait [#allocation4], 256  }
  0x44   :  { %260 = vsyncadd [#allocation4], 4294967040 }
  0x45   :  { %161 = vsyncpa [#allocation3], 1 }
  0x46   :  { %162 = vsyncpa [#allocation4], 1 }
  0x47   :  { %163 = vsyncpa [#allocation5], 1 }
  0x48   :  { %164 = vsyncpa [#allocation7], 1 }

</bundles_post_ra>
